<compile_context>
chip_gen: v6e
topology: v6e:2x2x1
jax: 0.10.0
libtpu: 0.0.40
codegen_flags: <defaults>
</compile_context>

<pallas_src>
from functools import partial

import jax
import jax.numpy as jnp
from jax.experimental import pallas as pl
from jax.experimental.pallas import tpu as pltpu

INPUT_SIZE = 784
HIDDEN_SIZE = 500
NUM_CLASSES = 10
HIDDEN_PADDED = 512     # 500 -> 512: multiple of 128 lanes / 16 sublanes (bf16)
PADDED_CLASSES = 128    # 10  -> 128: lane-dense output width


def _round_up(x, m):
    return ((x + m - 1) // m) * m


def mlp_kernel(x_ref, w1_ref, b1_ref, w2_ref, b2_ref, o_ref):
    # Cast the streamed f32 x tile to bf16 in-kernel (hides under MXU / DMA).
    xb = x_ref[...].astype(jnp.bfloat16)
    # fc1: bf16 x bf16 -> f32 accumulate on the MXU.
    h = jnp.dot(xb, w1_ref[...], preferred_element_type=jnp.float32)
    # Bias + ReLU in f32 (cheap VPU work).
    h = jnp.maximum(h + b1_ref[...], 0.0)
    # fc2: cast activations to bf16 for an MXU-native pass, f32 accumulate.
    out = jnp.dot(h.astype(jnp.bfloat16), w2_ref[...],
                  preferred_element_type=jnp.float32)
    o_ref[...] = (out + b2_ref[...]).astype(o_ref.dtype)


def prepare_params(w1, b1, w2, b2):
    """One-time pad/cast of the weights (do this at init, not per forward).

    w1: [784, 500] f32, b1: [1, 500] f32, w2: [500, 10] f32, b2: [1, 10] f32
    -> (w1p [784,512] bf16, b1p [1,512] f32, w2p [512,128] bf16, b2p [1,128] f32)
    Zero padding is exact: padded hidden units have zero in-weights and bias
    (ReLU(0)=0) and zero out-weights, padded class lanes are sliced off.
    """
    w1p = (jnp.zeros((INPUT_SIZE, HIDDEN_PADDED), jnp.bfloat16)
           .at[:, :HIDDEN_SIZE].set(w1.astype(jnp.bfloat16)))
    b1p = (jnp.zeros((1, HIDDEN_PADDED), jnp.float32)
           .at[:, :HIDDEN_SIZE].set(b1.astype(jnp.float32)))
    w2p = (jnp.zeros((HIDDEN_PADDED, PADDED_CLASSES), jnp.bfloat16)
           .at[:HIDDEN_SIZE, :NUM_CLASSES].set(w2.astype(jnp.bfloat16)))
    b2p = (jnp.zeros((1, PADDED_CLASSES), jnp.float32)
           .at[:, :NUM_CLASSES].set(b2.astype(jnp.float32)))
    return w1p, b1p, w2p, b2p


@partial(jax.jit, static_argnames=("tile_b",))
def nn_forward(x, w1p, b1p, w2p, b2p, *, tile_b=1024):
    """x: [B, 784] f32, prepared params from prepare_params -> logits [B, 10] f32."""
    B = x.shape[0]

    # Tile selection: big tiles amortize per-step overhead, but keep >= 2 grid
    # steps when possible so both v7x TensorCores get work. Multiple of 16 rows.
    tile_b = max(16, min(int(tile_b), _round_up(pl.cdiv(B, 2), 16)))
    grid = (pl.cdiv(B, tile_b),)

    flops = 2 * B * (INPUT_SIZE * HIDDEN_PADDED + HIDDEN_PADDED * PADDED_CLASSES)
    bytes_accessed = (
        B * INPUT_SIZE * 4                        # x (f32, streamed once)
        + INPUT_SIZE * HIDDEN_PADDED * 2          # W1 (bf16, resident)
        + HIDDEN_PADDED * PADDED_CLASSES * 2      # W2 (bf16, resident)
        + (HIDDEN_PADDED + PADDED_CLASSES) * 4    # biases (f32)
        + B * PADDED_CLASSES * 4                  # output (f32)
    )

    out = pl.pallas_call(
        mlp_kernel,
        out_shape=jax.ShapeDtypeStruct((B, PADDED_CLASSES), jnp.float32),
        grid_spec=pltpu.PrefetchScalarGridSpec(
            num_scalar_prefetch=0,
            grid=grid,
            in_specs=[
                pl.BlockSpec((tile_b, INPUT_SIZE), lambda i: (i, 0)),            # x tile
                pl.BlockSpec((INPUT_SIZE, HIDDEN_PADDED), lambda i: (0, 0)),     # W1 (resident)
                pl.BlockSpec((1, HIDDEN_PADDED), lambda i: (0, 0)),              # b1 (resident)
                pl.BlockSpec((HIDDEN_PADDED, PADDED_CLASSES), lambda i: (0, 0)), # W2 (resident)
                pl.BlockSpec((1, PADDED_CLASSES), lambda i: (0, 0)),             # b2 (resident)
            ],
            out_specs=pl.BlockSpec((tile_b, PADDED_CLASSES), lambda i: (i, 0)),
        ),
        compiler_params=pltpu.CompilerParams(
            dimension_semantics=("parallel",),
            vmem_limit_bytes=32 * 1024 * 1024,
        ),
        cost_estimate=pl.CostEstimate(
            flops=flops, transcendentals=0, bytes_accessed=bytes_accessed),
    )(x, w1p, b1p, w2p, b2p)

    # Ragged last batch block: rows beyond B are never written; only the class
    # lanes need slicing here.
    return out[:, :NUM_CLASSES]


def reference_forward(x, w1, b1, w2, b2):
    """Pure-JAX reference with the same bf16-input / f32-accumulate numerics."""
    f32 = jnp.float32
    xb = x.astype(jnp.bfloat16).astype(f32)
    w1b = w1.astype(jnp.bfloat16).astype(f32)
    w2b = w2.astype(jnp.bfloat16).astype(f32)
    h = jnp.maximum(jnp.dot(xb, w1b, precision=jax.lax.Precision.HIGHEST) + b1, 0.0)
    hb = h.astype(jnp.bfloat16).astype(f32)
    return jnp.dot(hb, w2b, precision=jax.lax.Precision.HIGHEST) + b2


def init_params(key):
    """Deterministic init matching nn.Linear's U(-1/sqrt(fan_in), 1/sqrt(fan_in))."""
    k1, k2, k3, k4 = jax.random.split(key, 4)
    bound1 = 1.0 / jnp.sqrt(INPUT_SIZE)
    bound2 = 1.0 / jnp.sqrt(HIDDEN_SIZE)
    w1 = jax.random.uniform(k1, (INPUT_SIZE, HIDDEN_SIZE), jnp.float32, -bound1, bound1)
    b1 = jax.random.uniform(k2, (1, HIDDEN_SIZE), jnp.float32, -bound1, bound1)
    w2 = jax.random.uniform(k3, (HIDDEN_SIZE, NUM_CLASSES), jnp.float32, -bound2, bound2)
    b2 = jax.random.uniform(k4, (1, NUM_CLASSES), jnp.float32, -bound2, bound2)
    return w1, b1, w2, b2


if __name__ == "__main__":
    key = jax.random.PRNGKey(0)
    kx, kx2, kp = jax.random.split(key, 3)
    w1, b1, w2, b2 = init_params(kp)
    params = prepare_params(w1, b1, w2, b2)   # pad/cast ONCE (not per forward)

    # Small batch: single (partial) tile, B=2 rows valid inside a 16-row block.
    B = 2
    x = jax.random.normal(kx, (B, INPUT_SIZE), jnp.float32)
    logits = nn_forward(x, *params)
    jax.block_until_ready(logits)

    assert logits.shape == (B, NUM_CLASSES)
    ref = reference_forward(x, w1, b1, w2, b2)
    assert jnp.allclose(logits, ref, atol=1e-3, rtol=1e-3)
    # Loose check vs pure-f32 math (bf16 inputs only perturb logits slightly).
    ref_f32 = jnp.maximum(x @ w1 + b1, 0.0) @ w2 + b2
    assert jnp.allclose(logits, ref_f32, atol=5e-2, rtol=5e-2)

    # Multi-tile grid + ragged last block (no wrapper pad): 37 rows, tile_b=16
    # -> grid of 3 steps, last block has 5 valid rows.
    B2 = 37
    x2 = jax.random.normal(kx2, (B2, INPUT_SIZE), jnp.float32)
    logits2 = nn_forward(x2, *params, tile_b=16)
    jax.block_until_ready(logits2)
    assert logits2.shape == (B2, NUM_CLASSES)
    ref2 = reference_forward(x2, w1, b1, w2, b2)
    assert jnp.allclose(logits2, ref2, atol=1e-3, rtol=1e-3)

    print("KERNEL_OK")
</pallas_src>

<mosaic_0001>
module attributes {stable_mosaic.version = 11 : i64} {
  func.func @mlp_kernel(%arg0: i32, %arg1: memref<16x784xf32, #tpu.memory_space<vmem>>, %arg2: memref<784x512xbf16, #tpu.memory_space<vmem>>, %arg3: memref<1x512xf32, #tpu.memory_space<vmem>>, %arg4: memref<512x128xbf16, #tpu.memory_space<vmem>>, %arg5: memref<1x128xf32, #tpu.memory_space<vmem>>, %arg6: memref<16x128xf32, #tpu.memory_space<vmem>>) attributes {dimension_semantics = [#tpu.dimension_semantics<parallel>], iteration_bounds = array<i64: 1>, scalar_prefetch = 0 : i64, scratch_operands = 0 : i64, tpu.core_type = #tpu.core_type<tc>, window_params = [{transform_indices = @transform_0, window_bounds = array<i64: 16, 784>}, {pipeline_mode = #tpu.pipeline_mode<synchronous>, transform_indices = @transform_1, window_bounds = array<i64: 784, 512>}, {pipeline_mode = #tpu.pipeline_mode<synchronous>, transform_indices = @transform_2, window_bounds = array<i64: 1, 512>}, {pipeline_mode = #tpu.pipeline_mode<synchronous>, transform_indices = @transform_3, window_bounds = array<i64: 512, 128>}, {pipeline_mode = #tpu.pipeline_mode<synchronous>, transform_indices = @transform_4, window_bounds = array<i64: 1, 128>}, {transform_indices = @transform_5, window_bounds = array<i64: 16, 128>}]} {
    %c0 = arith.constant 0 : index
    %c0_0 = arith.constant 0 : index
    %0 = vector.load %arg1[%c0, %c0_0] : memref<16x784xf32, #tpu.memory_space<vmem>>, vector<16x784xf32>
    %1 = arith.truncf %0 : vector<16x784xf32> to vector<16x784xbf16>
    %c0_1 = arith.constant 0 : index
    %c0_2 = arith.constant 0 : index
    %2 = vector.load %arg2[%c0_1, %c0_2] : memref<784x512xbf16, #tpu.memory_space<vmem>>, vector<784x512xbf16>
    %cst = arith.constant dense<0.000000e+00> : vector<16x512xf32>
    %3 = tpu.matmul %1, %2, %cst {dimension_numbers = #tpu.dot_dimension_numbers<[1], [0], [0], [1], [0, 0, 1, 1], [], []>} : vector<16x784xbf16>, vector<784x512xbf16>, vector<16x512xf32> -> vector<16x512xf32>
    %c0_3 = arith.constant 0 : index
    %c0_4 = arith.constant 0 : index
    %4 = vector.load %arg3[%c0_3, %c0_4] : memref<1x512xf32, #tpu.memory_space<vmem>>, vector<1x512xf32>
    %5 = vector.broadcast %4 : vector<1x512xf32> to vector<16x512xf32>
    %6 = arith.addf %3, %5 : vector<16x512xf32>
    %cst_5 = arith.constant 0.000000e+00 : f32
    %7 = vector.broadcast %cst_5 : f32 to vector<16x512xf32>
    %8 = arith.maximumf %6, %7 : vector<16x512xf32>
    %9 = arith.truncf %8 : vector<16x512xf32> to vector<16x512xbf16>
    %c0_6 = arith.constant 0 : index
    %c0_7 = arith.constant 0 : index
    %10 = vector.load %arg4[%c0_6, %c0_7] : memref<512x128xbf16, #tpu.memory_space<vmem>>, vector<512x128xbf16>
    %cst_8 = arith.constant dense<0.000000e+00> : vector<16x128xf32>
    %11 = tpu.matmul %9, %10, %cst_8 {dimension_numbers = #tpu.dot_dimension_numbers<[1], [0], [0], [1], [0, 0, 1, 1], [], []>} : vector<16x512xbf16>, vector<512x128xbf16>, vector<16x128xf32> -> vector<16x128xf32>
    %c0_9 = arith.constant 0 : index
    %c0_10 = arith.constant 0 : index
    %12 = vector.load %arg5[%c0_9, %c0_10] : memref<1x128xf32, #tpu.memory_space<vmem>>, vector<1x128xf32>
    %13 = vector.broadcast %12 : vector<1x128xf32> to vector<16x128xf32>
    %14 = arith.addf %11, %13 : vector<16x128xf32>
    %c0_11 = arith.constant 0 : index
    %c0_12 = arith.constant 0 : index
    %15 = vector.load %arg6[%c0_11, %c0_12] : memref<16x128xf32, #tpu.memory_space<vmem>>, vector<16x128xf32>
    tpu.vector_store %arg6[%c0_11, %c0_12], %14 {strides = array<i32>} : memref<16x128xf32, #tpu.memory_space<vmem>>, vector<16x128xf32>,
    return
  }
  func.func @transform_0(%arg0: i32) -> (i32, i32) {
    %c0_i32 = arith.constant 0 : i32
    %c0_i32_0 = arith.constant 0 : i32
    return %arg0, %c0_i32 : i32, i32
  }
  func.func @transform_1(%arg0: i32) -> (i32, i32) {
    %c0_i32 = arith.constant 0 : i32
    %c0_i32_0 = arith.constant 0 : i32
    %c0_i32_1 = arith.constant 0 : i32
    return %c0_i32, %c0_i32_0 : i32, i32
  }
  func.func @transform_2(%arg0: i32) -> (i32, i32) {
    %c0_i32 = arith.constant 0 : i32
    %c0_i32_0 = arith.constant 0 : i32
    %c0_i32_1 = arith.constant 0 : i32
    return %c0_i32, %c0_i32_0 : i32, i32
  }
  func.func @transform_3(%arg0: i32) -> (i32, i32) {
    %c0_i32 = arith.constant 0 : i32
    %c0_i32_0 = arith.constant 0 : i32
    %c0_i32_1 = arith.constant 0 : i32
    return %c0_i32, %c0_i32_0 : i32, i32
  }
  func.func @transform_4(%arg0: i32) -> (i32, i32) {
    %c0_i32 = arith.constant 0 : i32
    %c0_i32_0 = arith.constant 0 : i32
    %c0_i32_1 = arith.constant 0 : i32
    return %c0_i32, %c0_i32_0 : i32, i32
  }
  func.func @transform_5(%arg0: i32) -> (i32, i32) {
    %c0_i32 = arith.constant 0 : i32
    %c0_i32_0 = arith.constant 0 : i32
    return %arg0, %c0_i32 : i32, i32
  }
}

</mosaic_0001>

<bundles_post_ra>
// kernel: nn_forward.1
= control target key start
LH: loop header
LB: loop body
LE: loop exit
PB: predicated region body
PF: predicated region fallthrough
CT: control target
= control target key end

     0   :  { %10 = vsyncpa [#allocation3], 0  ;;  %s3078_s0 = inlined_call_operand.hbm [shape: f32[2,784], index: 0, kind: input, shape index: {}]   ;;  %s3079_s1 = inlined_call_operand.hbm [shape: bf16[784,512], index: 1, kind: input, shape index: {}]   ;;  %s3080_s2 = inlined_call_operand.hbm [shape: f32[1,512], index: 2, kind: input, shape index: {}]   ;;  %s3081_s3 = inlined_call_operand.hbm [shape: bf16[512,128], index: 3, kind: input, shape index: {}]   ;;  %s3082_s4 = inlined_call_operand.vmem [shape: f32[1,128], index: 4, kind: input, shape index: {}]   ;;  %s3083_s5 = inlined_call_operand.hbm [shape: f32[2,128], index: 5, kind: output, shape index: {}]  }
   0x1   :  { %11 = vsyncpa [#allocation6], 0 }
   0x2   :  { %12 = vsyncpa [#allocation9], 0 }
   0x3   :  { %13 = vsyncpa [#allocation4], 0 }
   0x4   :  { %18 = vsyncadd [#allocation3], 1568  ;;  %s2942_s18 = smov [#allocation5]  }
   0x5   :  { %s31_s19 = sshll.u32 %s2942_s18, 4  ;;  %s32_s19 = int_to_ptr.vmem [resolvable:$true] %s31_s19 }
   0x6   :  { %s2842_s20 = scalar_lea.vmem %s32_s19, 25088  ;;  %p2847_p1 = scmp.lt.s32.totalorder %s32_s19, %s32_s19 }
   0x7   :  { %p2843_p0 = scmp.ne.s32.totalorder %s32_s19, %s2842_s20  ;;  %p2848_p2 = scmp.lt.s32.totalorder %s2842_s20, %s2842_s20 }
   0x9   :  { %p2849_p3 = por %p2848_p2, %p2847_p1 }
   0xb   :  { %p2850_p4 = pnand %p2849_p3, %p2843_p0 }
   0xd   :  { %2853 = shalt.err (!%p2850_p4)
}
   0xe   :  { %s2943_s21 = smov 256   ;;  %s2944_s22 = smov 16  }
   0xf   :  { %37 = dma.hbm_to_vmem [thread:$0]  %s3079_s1, 25088, %s32_s19, [#allocation6], %s2943_s21, %s2943_s21, %s2944_s22  }
  0x10   :  { %s2945_s25 = smov [#allocation2]  }
  0x11   :  { %s19_s26 = sshll.u32 %s2945_s25, 4  ;;  %s20_s26 = int_to_ptr.vmem [resolvable:$true] %s19_s26 }
  0x12   :  { %s2862_s27 = scalar_lea.vmem %s20_s26, 224  ;;  %s2866_s28 = scalar_lea.vmem %s20_s26, 1792 }
  0x13   :  { %p2863_p5 = scmp.ne.s32.totalorder %s20_s26, %s2862_s27  ;;  %p2867_p6 = scmp.lt.s32.totalorder %s20_s26, %s20_s26 }
  0x14   :  { %p2868_p7 = scmp.lt.s32.totalorder %s2866_s28, %s2862_s27 }
  0x16   :  { %p2869_p8 = por %p2868_p7, %p2867_p6 }
  0x18   :  { %p2870_p9 = pnand %p2869_p8, %p2863_p5 }
  0x1a   :  { %2873 = shalt.err (!%p2870_p9)
}
  0x1b   :  { %s2946_s29 = smov 224   ;;  %s2947_s30 = smov 14  }
  0x1c   :  { %25 = dma.hbm_to_vmem [thread:$0]  %s3078_s0, 224, %s20_s26, [#allocation3], %s2946_s29, %s2946_s29, %s2947_s30  }
  0x1d   :  { %s2948_s8 = smov [#allocation7]   ;;  %s2949_s1 = smov [#allocation8]  }
  0x1e   :  { %s44_s9 = sshll.u32 %s2948_s8, 4  ;;  %s53_s10 = sshll.u32 %s2949_s1, 4  ;;  %s45_s9 = int_to_ptr.vmem [resolvable:$true] %s44_s9  ;;  %s54_s10 = int_to_ptr.vmem [resolvable:$true] %s53_s10 }
  0x1f   :  { %s2882_s11 = scalar_lea.vmem %s45_s9, 64  ;;  %p2887_p11 = scmp.lt.s32.totalorder %s45_s9, %s45_s9 }
  0x20   :  { %p2883_p10 = scmp.ne.s32.totalorder %s45_s9, %s2882_s11  ;;  %p2888_p12 = scmp.lt.s32.totalorder %s2882_s11, %s2882_s11 }
  0x22   :  { %p2889_p13 = por %p2888_p12, %p2887_p11 }
  0x24   :  { %p2890_p0 = pnand %p2889_p13, %p2883_p10 }
  0x26   :  { %2893 = shalt.err (!%p2890_p0)
}
  0x27   :  { %47 = dma.hbm_to_vmem [thread:$0]  %s3080_s2, 64, %s45_s9, [#allocation6]  }
  0x28   :  { %s2902_s14 = scalar_lea.vmem %s54_s10, 4096  ;;  %p2907_p2 = scmp.lt.s32.totalorder %s54_s10, %s54_s10 }
  0x29   :  { %p2903_p1 = scmp.ne.s32.totalorder %s54_s10, %s2902_s14  ;;  %p2908_p3 = scmp.lt.s32.totalorder %s2902_s14, %s2902_s14 }
  0x2b   :  { %p2909_p4 = por %p2908_p3, %p2907_p2 }
  0x2d   :  { %p2910_p5 = pnand %p2909_p4, %p2903_p1 }
  0x2f   :  { %2913 = shalt.err (!%p2910_p5)
}
  0x30   :  { %s2950_s0 = smov 64   ;;  %s2951_s15 = smov 4  }
  0x31   :  { %59 = dma.hbm_to_vmem [thread:$0]  %s3081_s3, 4096, %s54_s10, [#allocation9], %s2950_s0, %s2950_s0, %s2951_s15  }
  0x32   :  { %2934 = dma.done.wait [#allocation3], 1792  }
  0x33   :  { %2935 = vsyncadd [#allocation3], 4294965504 }
  0x34   :  { %2936 = dma.done.wait [#allocation6], 25152  }
  0x35   :  { %2937 = vsyncadd [#allocation6], 4294942144 }
  0x36   :  { %2938 = dma.done.wait [#allocation9], 4096  }
  0x37   :  { %2939 = vsyncadd [#allocation9], 4294963200  ;;  %v2484_v0 = vld [vmem:[#allocation5 + $0xe4] ss:$16 sps:$4 sm:$0xff]   ;;  %v2488_v2 = vld [vmem:[#allocation5 + $0xe0] ss:$16 sps:$4 sm:$0xff]   ;;  %v114_v41 = vlaneseq }
  0x38   :  { %v2486_v1 = vld [vmem:[#allocation5 + $0x2e4] ss:$16 sps:$4 sm:$0xff]   ;;  %1472 = vmatprep.subr.bf16.mxu0 %v2484_v0  ;;  %v2489_v3 = vld [vmem:[#allocation5 + $0x2e0] ss:$16 sps:$4 sm:$0xff]   ;;  %v2952_v39 = vmov 1983009808  }
  0x39   :  { %1515 = vmatprep.subr.bf16.mxu1 %v2486_v1  ;;  %v2490_v4 = vld [vmem:[#allocation5 + $0xc4] ss:$16 sps:$4 sm:$0xff]   ;;  %1473 = vmatpush1.bf16.msra.mxu0 %v2488_v2  ;;  %v2494_v6 = vld [vmem:[#allocation5 + $0xc0] ss:$16 sps:$4 sm:$0xff]   ;;  %v112_v40 = vunpack.c.l.s4 %v2952_v39  ;;  %v2999_v48 = vshrl.u32 %v114_v41, 7  ;;  %vm1468_vm0 = vcmask 130048  }
  0x3a   :  { %1516 = vmatpush1.bf16.msra.mxu1 %v2489_v3  ;;  %v2492_v5 = vld [vmem:[#allocation5 + $0x2c4] ss:$16 sps:$4 sm:$0xff]   ;;  %1474 = vmatprep.subr.bf16.mxu0 %v2490_v4  ;;  %v2495_v7 = vld [vmem:[#allocation5 + $0x2c0] ss:$16 sps:$4 sm:$0xff]   ;;  %v2582_v57 = vld [vmem:[#allocation2 + $0x1c] ss:$14 sps:$4 sm:$0xff]  }
  0x3b   :  { %1517 = vmatprep.subr.bf16.mxu1 %v2492_v5  ;;  %v2496_v8 = vld [vmem:[#allocation5 + $0xa4] ss:$16 sps:$4 sm:$0xff]   ;;  %v2500_v10 = vld [vmem:[#allocation5 + $0xa0] ss:$16 sps:$4 sm:$0xff]   ;;  %v113_v47 = vunpack.c.0.s8 %v112_v40  ;;  %v2590_v2 = vld [vmem:[#allocation2 + $0x3c] ss:$14 sps:$4 sm:$0xff]  }
  0x3c   :  { %v2498_v9 = vld [vmem:[#allocation5 + $0x2a4] ss:$16 sps:$4 sm:$0xff]   ;;  %v2501_v11 = vld [vmem:[#allocation5 + $0x2a0] ss:$16 sps:$4 sm:$0xff]  }
  0x3d   :  { %1475 = vmatpush1.bf16.msra.mxu0 %v2494_v6  ;;  %v2502_v12 = vld [vmem:[#allocation5 + $0x84] ss:$16 sps:$4 sm:$0xff]   ;;  %v2506_v14 = vld [vmem:[#allocation5 + $0x80] ss:$16 sps:$4 sm:$0xff]   ;;  %v3002_v55 = vsub.s32 %v113_v47, %v2999_v48  ;;  %v2603_v47 = vld [vmem:[#allocation5 + $0xec] ss:$16 sps:$4 sm:$0xff]  }
  0x3e   :  { %1518 = vmatpush1.bf16.msra.mxu1 %v2495_v7  ;;  %1476 = vmatprep.subr.bf16.mxu0 %v2496_v8  ;;  %v2504_v13 = vld [vmem:[#allocation5 + $0x284] ss:$16 sps:$4 sm:$0xff]   ;;  %v2507_v15 = vld [vmem:[#allocation5 + $0x280] ss:$16 sps:$4 sm:$0xff]  }
  0x3f   :  { %1519 = vmatprep.subr.bf16.mxu1 %v2498_v9  ;;  %v2508_v16 = vld [vmem:[#allocation5 + $0x64] ss:$16 sps:$4 sm:$0xff]   ;;  %v2512_v18 = vld [vmem:[#allocation5 + $0x60] ss:$16 sps:$4 sm:$0xff]   ;;  %v131_v0 = vrot.slane %v2582_v57, %v3002_v55 }
  0x40   :  { %v2510_v17 = vld [vmem:[#allocation5 + $0x264] ss:$16 sps:$4 sm:$0xff]   ;;  %v2513_v19 = vld [vmem:[#allocation5 + $0x260] ss:$16 sps:$4 sm:$0xff]  }
  0x41   :  { %1477 = vmatpush1.bf16.msra.mxu0 %v2500_v10  ;;  %v2514_v20 = vld [vmem:[#allocation5 + $0x44] ss:$16 sps:$4 sm:$0xff]   ;;  %v2518_v22 = vld [vmem:[#allocation5 + $0x40] ss:$16 sps:$4 sm:$0xff]  }
  0x42   :  { %1520 = vmatpush1.bf16.msra.mxu1 %v2501_v11  ;;  %1478 = vmatprep.subr.bf16.mxu0 %v2502_v12  ;;  %v2516_v21 = vld [vmem:[#allocation5 + $0x244] ss:$16 sps:$4 sm:$0xff]   ;;  %v2519_v23 = vld [vmem:[#allocation5 + $0x240] ss:$16 sps:$4 sm:$0xff]   ;;  %v195_v11 = vrot.slane %v2590_v2, %v3002_v55  ;;  %v2629_v2 = vld [vmem:[#allocation5 + $0x8c] ss:$16 sps:$4 sm:$0xff]  }
  0x43   :  { %1521 = vmatprep.subr.bf16.mxu1 %v2504_v13  ;;  %v2520_v24 = vld [vmem:[#allocation5 + $0x24] ss:$16 sps:$4 sm:$0xff]   ;;  %v2524_v26 = vld [vmem:[#allocation5 + $0x20] ss:$16 sps:$4 sm:$0xff]  }
  0x44   :  { %v2522_v25 = vld [vmem:[#allocation5 + $0x224] ss:$16 sps:$4 sm:$0xff]   ;;  %v2525_v27 = vld [vmem:[#allocation5 + $0x220] ss:$16 sps:$4 sm:$0xff]  }
  0x45   :  { %1479 = vmatpush1.bf16.msra.mxu0 %v2506_v14  ;;  %v2526_v28 = vld [vmem:[#allocation5 + $0x4] ss:$16 sps:$4 sm:$0xff]   ;;  %v2530_v30 = vld [vmem:[#allocation5] ss:$16 sps:$4 sm:$0xff]  }
  0x46   :  { %1522 = vmatpush1.bf16.msra.mxu1 %v2507_v15  ;;  %1480 = vmatprep.subr.bf16.mxu0 %v2508_v16  ;;  %v2528_v29 = vld [vmem:[#allocation5 + $0x204] ss:$16 sps:$4 sm:$0xff]   ;;  %v2531_v31 = vld [vmem:[#allocation5 + $0x200] ss:$16 sps:$4 sm:$0xff]  }
  0x47   :  { %1523 = vmatprep.subr.bf16.mxu1 %v2510_v17  ;;  %v2532_v32 = vld [vmem:[#allocation5 + $0x1e4] ss:$16 sps:$4 sm:$0xff]   ;;  %v2536_v34 = vld [vmem:[#allocation5 + $0x1e0] ss:$16 sps:$4 sm:$0xff]  }
  0x48   :  { %v2534_v33 = vld [vmem:[#allocation5 + $0x3e4] ss:$16 sps:$4 sm:$0xff]   ;;  %v2537_v35 = vld [vmem:[#allocation5 + $0x3e0] ss:$16 sps:$4 sm:$0xff]  }
  0x49   :  { %1481 = vmatpush1.bf16.msra.mxu0 %v2512_v18  ;;  %v2538_v36 = vld [vmem:[#allocation5 + $0x1c4] ss:$16 sps:$4 sm:$0xff]   ;;  %v2542_v38 = vld [vmem:[#allocation5 + $0x1c0] ss:$16 sps:$4 sm:$0xff]  }
  0x4a   :  { %1524 = vmatpush1.bf16.msra.mxu1 %v2513_v19  ;;  %1482 = vmatprep.subr.bf16.mxu0 %v2514_v20  ;;  %v2540_v37 = vld [vmem:[#allocation5 + $0x3c4] ss:$16 sps:$4 sm:$0xff]   ;;  %v2543_v42 = vld [vmem:[#allocation5 + $0x3c0] ss:$16 sps:$4 sm:$0xff]  }
  0x4b   :  { %1525 = vmatprep.subr.bf16.mxu1 %v2516_v21  ;;  %v2544_v43 = vld [vmem:[#allocation5 + $0x1a4] ss:$16 sps:$4 sm:$0xff]   ;;  %v2548_v45 = vld [vmem:[#allocation5 + $0x1a0] ss:$16 sps:$4 sm:$0xff]  }
  0x4c   :  { %v2546_v44 = vld [vmem:[#allocation5 + $0x3a4] ss:$16 sps:$4 sm:$0xff]   ;;  %v2549_v46 = vld [vmem:[#allocation5 + $0x3a0] ss:$16 sps:$4 sm:$0xff]  }
  0x4d   :  { %1483 = vmatpush1.bf16.msra.mxu0 %v2518_v22  ;;  %v2550_v49 = vld [vmem:[#allocation5 + $0x184] ss:$16 sps:$4 sm:$0xff]   ;;  %v2554_v51 = vld [vmem:[#allocation5 + $0x180] ss:$16 sps:$4 sm:$0xff]  }
  0x4e   :  { %1526 = vmatpush1.bf16.msra.mxu1 %v2519_v23  ;;  %1484 = vmatprep.subr.bf16.mxu0 %v2520_v24  ;;  %v2552_v50 = vld [vmem:[#allocation5 + $0x384] ss:$16 sps:$4 sm:$0xff]   ;;  %v2555_v52 = vld [vmem:[#allocation5 + $0x380] ss:$16 sps:$4 sm:$0xff]  }
  0x4f   :  { %1527 = vmatprep.subr.bf16.mxu1 %v2522_v25  ;;  %v2556_v53 = vld [vmem:[#allocation5 + $0x164] ss:$16 sps:$4 sm:$0xff]   ;;  %v2580_v56 = vld [vmem:[#allocation2] ss:$14 sps:$4 sm:$0xff]  }
  0x50   :  { %v2558_v54 = vld [vmem:[#allocation5 + $0x364] ss:$16 sps:$4 sm:$0xff]   ;;  %v2560_v58 = vld [vmem:[#allocation5 + $0x160] ss:$16 sps:$4 sm:$0xff]   ;;  %v117_v63 = vrot.slane %v2580_v56, %v3002_v55 }
  0x51   :  { %1485 = vmatpush1.bf16.msra.mxu0 %v2524_v26  ;;  %v2561_v59 = vld [vmem:[#allocation5 + $0x360] ss:$16 sps:$4 sm:$0xff]   ;;  %v2584_v60 = vld [vmem:[#allocation2 + $0x38] ss:$14 sps:$4 sm:$0xff]  }
  0x52   :  { %1528 = vmatpush1.bf16.msra.mxu1 %v2525_v27  ;;  %1486 = vmatprep.subr.bf16.mxu0 %v2526_v28  ;;  %v2586_v61 = vld [vmem:[#allocation2 + $0x54] ss:$14 sps:$4 sm:$0xff]   ;;  %v2591_v3 = vld [vmem:[#allocation2 + $0x58] ss:$14 sps:$4 sm:$0xff]   ;;  %v188_v5 = vrot.slane %v2584_v60, %v3002_v55  ;;  %v140_v9 = vcombine.high %v117_v63, %v131_v0  ;;  %v139_v27 = vcombine.low %v117_v63, %v131_v0 }
  0x53   :  { %1529 = vmatprep.subr.bf16.mxu1 %v2528_v29  ;;  %v2588_v62 = vld [vmem:[#allocation2 + $0x4] ss:$14 sps:$4 sm:$0xff]   ;;  %v2589_v1 = vld [vmem:[#allocation2 + $0x20] ss:$14 sps:$4 sm:$0xff]   ;;  %v202_v6 = vrot.slane %v2586_v61, %v3002_v55  ;;  %v209_v13 = vrot.slane %v2591_v3, %v3002_v55  ;;  %v2615_v60 = vld [vmem:[#allocation5 + $0xc8] ss:$16 sps:$4 sm:$0xff]  }
  0x54   :  { %v2562_v4 = vld [vmem:[#allocation5 + $0x144] ss:$16 sps:$4 sm:$0xff]   ;;  %v124_v7 = vrot.slane %v2588_v62, %v3002_v55  ;;  %v138_v10 = vrot.slane %v2589_v1, %v3002_v55  ;;  %v2566_v14 = vld [vmem:[#allocation5 + $0x140] ss:$16 sps:$4 sm:$0xff]   ;;  %v2623_v62 = vld [vmem:[#allocation5 + $0xac] ss:$16 sps:$4 sm:$0xff]  }
  0x55   :  { %1487 = vmatpush1.bf16.msra.mxu0 %v2530_v30  ;;  %v2564_v8 = vld [vmem:[#allocation5 + $0x344] ss:$16 sps:$4 sm:$0xff]   ;;  %v211_v12 = vcombine.high %v188_v5, %v202_v6  ;;  %v2567_v15 = vld [vmem:[#allocation5 + $0x340] ss:$16 sps:$4 sm:$0xff]   ;;  %v213_v19 = vcombine.high %v195_v11, %v209_v13  ;;  %v210_v28 = vcombine.low %v188_v5, %v202_v6  ;;  %v212_v30 = vcombine.low %v195_v11, %v209_v13  ;;  %v2621_v0 = vld [vmem:[#allocation5 + $0xa8] ss:$16 sps:$4 sm:$0xff]  }
  0x56   :  { %1530 = vmatpush1.bf16.msra.mxu1 %v2531_v31  ;;  %1488 = vmatprep.subr.bf16.mxu0 %v2532_v32  ;;  %v142_v16 = vcombine.high %v124_v7, %v138_v10  ;;  %v2568_v17 = vld [vmem:[#allocation5 + $0x124] ss:$16 sps:$4 sm:$0xff]   ;;  %v2572_v21 = vld [vmem:[#allocation5 + $0x120] ss:$16 sps:$4 sm:$0xff]   ;;  %v141_v29 = vcombine.low %v124_v7, %v138_v10  ;;  %v2635_v6 = vld [vmem:[#allocation5 + $0x6c] ss:$16 sps:$4 sm:$0xff]  }
  0x57   :  { %1531 = vmatprep.subr.bf16.mxu1 %v2534_v33  ;;  %v3012_v18 = vpack.c.bf16 %v211_v12, %v140_v9  ;;  %v2570_v20 = vld [vmem:[#allocation5 + $0x324] ss:$16 sps:$4 sm:$0xff]   ;;  %v2573_v22 = vld [vmem:[#allocation5 + $0x320] ss:$16 sps:$4 sm:$0xff]   ;;  %v2641_v10 = vld [vmem:[#allocation5 + $0x4c] ss:$16 sps:$4 sm:$0xff]  }
  0x58   :  { %v3015_v23 = vpack.c.bf16 %v213_v19, %v142_v16  ;;  %v2574_v24 = vld [vmem:[#allocation5 + $0x104] ss:$16 sps:$4 sm:$0xff]   ;;  %v2607_v26 = vld [vmem:[#allocation2 + $0xc] ss:$14 sps:$4 sm:$0x33]   ;;  %v3020_v39 = vpack.c.bf16 %v212_v30, %v141_v29 }
  0x59   :  { %1489 = vmatpush2.bf16.msra.mxu0 %v2536_v34  ;;  %1504 = vmatprep.mubr.bf16.mxu0 %v3012_v18  ;;  %v2576_v25 = vld [vmem:[#allocation5 + $0x304] ss:$16 sps:$4 sm:$0xff]   ;;  %v2578_v33 = vld [vmem:[#allocation5 + $0x100] ss:$16 sps:$4 sm:$0xff]   ;;  %v160_v41 = vrot.slane %v2607_v26, %v3002_v55  ;;  %v2639_v12 = vld [vmem:[#allocation5 + $0x48] ss:$16 sps:$4 sm:$0xff]  }
  0x5a   :  { %1532 = vmatpush2.bf16.msra.mxu1 %v2537_v35  ;;  %1490 = vmatprep.subr.bf16.mxu0 %v2538_v36  ;;  %v2609_v31 = vld [vmem:[#allocation2 + $0x28] ss:$14 sps:$4 sm:$0x33]   ;;  %v2611_v32 = vld [vmem:[#allocation2 + $0x44] ss:$14 sps:$4 sm:$0x33]  }
  0x5b   :  { %1533 = vmatprep.subr.bf16.mxu1 %v2540_v37  ;;  %1547 = vmatprep.mubr.bf16.mxu1 %v3015_v23  ;;  %v2613_v34 = vld [vmem:[#allocation2 + $0x60] ss:$14 sps:$4 sm:$0x33]   ;;  %v2594_v36 = vld [vmem:[#allocation5 + $0x4e4] ss:$16 sps:$4 sm:$0xff]  }
  0x5c   :  { %v2579_v35 = vld [vmem:[#allocation5 + $0x300] ss:$16 sps:$4 sm:$0xff]   ;;  %v2597_v37 = vld [vmem:[#allocation5 + $0x604] ss:$16 sps:$4 sm:$0xff]   ;;  %v2696_v19 = vld [vmem:[#allocation2 + $0x5c] ss:$14 sps:$4 sm:$0xff]  }
  0x5d   :  { %1491 = vmatpush2.bf16.msra.mxu0 %v2542_v38  ;;  %v3018_v38 = vpack.c.bf16 %v210_v28, %v139_v27  ;;  %v2592_v40 = vld [vmem:[#allocation5 + $0x4e0] ss:$16 sps:$4 sm:$0xff]   ;;  %v2626_v63 = vld [vmem:[#allocation5 + $0x464] ss:$16 sps:$4 sm:$0xff]   ;;  %v3044_v26 = vrot.slane %v2696_v19, %v3002_v55  ;;  %v2653_v27 = vld [vmem:[#allocation5 + $0xc] ss:$16 sps:$4 sm:$0xff]  }
  0x5e   :  { %1534 = vmatpush2.bf16.msra.mxu1 %v2543_v42  ;;  %1492 = vmatprep.subr.bf16.mxu0 %v2544_v43  ;;  %v174_v42 = vrot.slane %v2609_v31, %v3002_v55  ;;  %v231_v43 = vrot.slane %v2611_v32, %v3002_v55  ;;  %v2604_v57 = vld [vmem:[#allocation5 + $0x4a0] ss:$16 sps:$4 sm:$0xff]   ;;  %v2632_v3 = vld [vmem:[#allocation5 + $0x444] ss:$16 sps:$4 sm:$0xff]   ;;  %v2651_v31 = vld [vmem:[#allocation5 + $0x8] ss:$16 sps:$4 sm:$0xff]  }
  0x5f   :  { %1535 = vmatprep.subr.bf16.mxu1 %v2546_v44  ;;  %v245_v44 = vrot.slane %v2613_v34, %v3002_v55  ;;  %v2618_v61 = vld [vmem:[#allocation5 + $0x480] ss:$16 sps:$4 sm:$0xff]   ;;  %v2638_v7 = vld [vmem:[#allocation5 + $0x424] ss:$16 sps:$4 sm:$0xff]   ;;  %v2726_v19 = vld [vmem:[#allocation5 + $0x26c] ss:$16 sps:$4 sm:$0xff]  }
  0x60   :  { %v2624_v1 = vld [vmem:[#allocation5 + $0x460] ss:$16 sps:$4 sm:$0xff]   ;;  %v2644_v11 = vld [vmem:[#allocation5 + $0x404] ss:$16 sps:$4 sm:$0xff]  }
  0x61   :  { %1493 = vmatpush2.bf16.msra.mxu0 %v2548_v45  ;;  %v2595_v45 = vld [vmem:[#allocation5 + $0x600] ss:$16 sps:$4 sm:$0xff]   ;;  %v2693_v16 = vld [vmem:[#allocation2 + $0x8] ss:$14 sps:$4 sm:$0xff]  }
  0x62   :  { %1536 = vmatpush2.bf16.msra.mxu1 %v2549_v46  ;;  %1494 = vmatprep.subr.bf16.mxu0 %v2550_v49  ;;  %v2600_v46 = vld [vmem:[#allocation5 + $0x4c4] ss:$16 sps:$4 sm:$0xff]   ;;  %v177_v49 = vcombine.low %v160_v41, %v174_v42  ;;  %v2630_v5 = vld [vmem:[#allocation5 + $0x440] ss:$16 sps:$4 sm:$0xff]   ;;  %v2663_v41 = vld [vmem:[#allocation5 + $0x1c8] ss:$16 sps:$4 sm:$0xff]  }
  0x63   :  { %1537 = vmatprep.subr.bf16.mxu1 %v2552_v50  ;;  %v248_v50 = vcombine.low %v231_v43, %v245_v44  ;;  %v2636_v9 = vld [vmem:[#allocation5 + $0x420] ss:$16 sps:$4 sm:$0xff]   ;;  %v2656_v28 = vld [vmem:[#allocation5 + $0x5c4] ss:$16 sps:$4 sm:$0xff]   ;;  %v2671_v43 = vld [vmem:[#allocation5 + $0x1ac] ss:$16 sps:$4 sm:$0xff]  }
  0x64   :  { %v2642_v13 = vld [vmem:[#allocation5 + $0x400] ss:$16 sps:$4 sm:$0xff]   ;;  %v2662_v34 = vld [vmem:[#allocation5 + $0x5a4] ss:$16 sps:$4 sm:$0xff]  }
  0x65   :  { %1495 = vmatpush2.bf16.msra.mxu0 %v2554_v51  ;;  %v2598_v51 = vld [vmem:[#allocation5 + $0x4c0] ss:$16 sps:$4 sm:$0xff]   ;;  %v3029_v56 = vpack.c.bf16 %v248_v50, %v177_v49  ;;  %v2674_v44 = vld [vmem:[#allocation5 + $0x564] ss:$16 sps:$4 sm:$0xff]   ;;  %v2675_v50 = vld [vmem:[#allocation5 + $0x188] ss:$16 sps:$4 sm:$0xff]  }
  0x66   :  { %1538 = vmatpush2.bf16.msra.mxu1 %v2555_v52  ;;  %1496 = vmatprep.subr.bf16.mxu0 %v2556_v53  ;;  %v2953_v52 = vmov 0   ;;  %v2606_v53 = vld [vmem:[#allocation5 + $0x4a4] ss:$16 sps:$4 sm:$0xff]   ;;  %v2654_v32 = vld [vmem:[#allocation5 + $0x5c0] ss:$16 sps:$4 sm:$0xff]  }
  0x67   :  { %1539 = vmatprep.subr.bf16.mxu1 %v2558_v54  ;;  %v2601_v54 = vld [vmem:[#allocation5 + $0xe8] ss:$16 sps:$4 sm:$0xff]   ;;  %v2666_v42 = vld [vmem:[#allocation5 + $0x580] ss:$16 sps:$4 sm:$0xff]   ;;  %v2680_v49 = vld [vmem:[#allocation5 + $0x544] ss:$16 sps:$4 sm:$0xff]  }
  0x69   :  { %1497 = vmatpush2.bf16.msra.mxu0 %v2560_v58  ;;  %v2617_v58 = vld [vmem:[#allocation5 + $0xcc] ss:$16 sps:$4 sm:$0xff]  }
  0x6a   :  { %1540 = vmatpush2.bf16.msra.mxu1 %v2561_v59  ;;  %1498 = vmatprep.subr.bf16.mxu0 %v2562_v4  ;;  %v2620_v59 = vld [vmem:[#allocation5 + $0x484] ss:$16 sps:$4 sm:$0xff]   ;;  %v2627_v4 = vld [vmem:[#allocation5 + $0x88] ss:$16 sps:$4 sm:$0xff]  }
  0x6b   :  { %1541 = vmatprep.subr.bf16.mxu1 %v2564_v8  ;;  %v2633_v8 = vld [vmem:[#allocation5 + $0x68] ss:$16 sps:$4 sm:$0xff]  }
  0x6d   :  { %1499 = vmatpush2.bf16.msra.mxu0 %v2566_v14  ;;  %v2647_v14 = vld [vmem:[#allocation5 + $0x2c] ss:$16 sps:$4 sm:$0xff]  }
  0x6e   :  { %1542 = vmatpush2.bf16.msra.mxu1 %v2567_v15  ;;  %1500 = vmatprep.subr.bf16.mxu0 %v2568_v17  ;;  %v2650_v15 = vld [vmem:[#allocation5 + $0x5e4] ss:$16 sps:$4 sm:$0xff]  }
  0x6f   :  { %1543 = vmatprep.subr.bf16.mxu1 %v2570_v20  ;;  %v2694_v17 = vld [vmem:[#allocation2 + $0x24] ss:$14 sps:$4 sm:$0xff]   ;;  %v2645_v20 = vld [vmem:[#allocation5 + $0x28] ss:$16 sps:$4 sm:$0xff]  }
  0x71   :  { %1501 = vmatpush2.bf16.msra.mxu0 %v2572_v21  ;;  %v3035_v21 = vrot.slane %v2693_v16, %v3002_v55  ;;  %v2715_v16 = vld [vmem:[#allocation5 + $0x4c8] ss:$16 sps:$4 sm:$0xff]  }
  0x72   :  { %1544 = vmatpush2.bf16.msra.mxu1 %v2573_v22  ;;  %1502 = vmatprep.subr.bf16.mxu0 %v2574_v24  ;;  %v2648_v22 = vld [vmem:[#allocation5 + $0x5e0] ss:$16 sps:$4 sm:$0xff]   ;;  %v3038_v24 = vrot.slane %v2694_v17, %v3002_v55  ;;  %v2718_v17 = vld [vmem:[#allocation5 + $0x288] ss:$16 sps:$4 sm:$0xff]  }
  0x73   :  { %1545 = vmatprep.subr.bf16.mxu1 %v2576_v25 }
  0x74   :  { %v176_v29 = vcombine.high %v3035_v21, %v3038_v24 }
  0x75   :  { %1503 = vmatpush2.bf16.msra.mxu0 %v2578_v33 }
  0x76   :  { %1546 = vmatpush2.bf16.msra.mxu1 %v2579_v35  ;;  %1558 = vmatprep.subr.bf16.mxu0 %v2594_v36  ;;  %v2657_v35 = vld [vmem:[#allocation5 + $0x1e8] ss:$16 sps:$4 sm:$0xff]   ;;  %v2660_v36 = vld [vmem:[#allocation5 + $0x5a0] ss:$16 sps:$4 sm:$0xff]  }
  0x77   :  { %1615 = vmatprep.subr.bf16.mxu1 %v2597_v37  ;;  %v2665_v37 = vld [vmem:[#allocation5 + $0x1cc] ss:$16 sps:$4 sm:$0xff]  }
  0x78   :  { %1505 = vmatmul.mubr.bf16.vlgmr.msra.gmra.mxu0 %v3018_v38 }
  0x79   :  { %1548 = vmatmul.mubr.bf16.vlgmr.msra.gmra.mxu1 %v3020_v39  ;;  %1559 = vmatpush1.bf16.msra.mxu0 %v2592_v40  ;;  %v2668_v40 = vld [vmem:[#allocation5 + $0x584] ss:$16 sps:$4 sm:$0xff]  }
  0x7a   :  { %1616 = vmatpush1.bf16.msra.mxu1 %v2595_v45  ;;  %1560 = vmatprep.subr.bf16.mxu0 %v2600_v46  ;;  %v2669_v45 = vld [vmem:[#allocation5 + $0x1a8] ss:$16 sps:$4 sm:$0xff]   ;;  %v2672_v46 = vld [vmem:[#allocation5 + $0x560] ss:$16 sps:$4 sm:$0xff]  }
  0x7b   :  { %1633 = vmatprep.mubr.bf16.mxu1 %v2953_v52  ;;  %1644 = vmatprep.subr.bf16.mxu1 %v2603_v47  ;;  %v2677_v47 = vld [vmem:[#allocation5 + $0x18c] ss:$16 sps:$4 sm:$0xff]  }
  0x7d   :  { %1561 = vmatpush1.bf16.msra.mxu0 %v2598_v51  ;;  %v2678_v51 = vld [vmem:[#allocation5 + $0x540] ss:$16 sps:$4 sm:$0xff]  }
  0x7e   :  { %1562 = vmatprep.subr.bf16.mxu0 %v2606_v53  ;;  %v2683_v53 = vld [vmem:[#allocation5 + $0x16c] ss:$16 sps:$4 sm:$0xff]  }
  0x81   :  { %2390 = vmatmul.mubr.msk.bf16.vlgmr.msra.gmra.mxu1 %vm1468_vm0, %v3029_v56  ;;  %1563 = vmatpush1.bf16.msra.mxu0 %v2604_v57  ;;  %v2681_v57 = vld [vmem:[#allocation5 + $0x168] ss:$16 sps:$4 sm:$0xff]  }
  0x82   :  { %1645 = vmatpush1.bf16.msra.mxu1 %v2601_v54  ;;  %1564 = vmatprep.subr.bf16.mxu0 %v2620_v59  ;;  %v2686_v54 = vld [vmem:[#allocation5 + $0x524] ss:$16 sps:$4 sm:$0xff]   ;;  %v2689_v59 = vld [vmem:[#allocation5 + $0x14c] ss:$16 sps:$4 sm:$0xff]  }
  0x83   :  { %1646 = vmatprep.subr.bf16.mxu1 %v2617_v58  ;;  %1676 = vmatprep.mubr.bf16.mxu1 %v3012_v18  ;;  %v2695_v18 = vld [vmem:[#allocation2 + $0x40] ss:$14 sps:$4 sm:$0xff]  }
  0x84   :  { %v3041_v25 = vrot.slane %v2695_v18, %v3002_v55  ;;  %v2659_v55 = vld [vmem:[#allocation5 + $0x1ec] ss:$16 sps:$4 sm:$0xff]   ;;  %v2684_v58 = vld [vmem:[#allocation5 + $0x520] ss:$16 sps:$4 sm:$0xff]  }
  0x85   :  { %1565 = vmatpush1.bf16.msra.mxu0 %v2618_v61  ;;  %v2687_v61 = vld [vmem:[#allocation5 + $0x148] ss:$16 sps:$4 sm:$0xff]   ;;  %v2723_v18 = vld [vmem:[#allocation5 + $0x4ac] ss:$16 sps:$4 sm:$0xff]  }
  0x86   :  { %1647 = vmatpush1.bf16.msra.mxu1 %v2615_v60  ;;  %1566 = vmatprep.subr.bf16.mxu0 %v2626_v63  ;;  %v247_v30 = vcombine.high %v3041_v25, %v3044_v26  ;;  %v2692_v60 = vld [vmem:[#allocation5 + $0x504] ss:$16 sps:$4 sm:$0xff]   ;;  %v246_v63 = vcombine.low %v3041_v25, %v3044_v26  ;;  %v2735_v25 = vld [vmem:[#allocation5 + $0x46c] ss:$16 sps:$4 sm:$0xff]  }
  0x87   :  { %1648 = vmatprep.subr.bf16.mxu1 %v2623_v62  ;;  %v175_v62 = vcombine.low %v3035_v21, %v3038_v24  ;;  %v2729_v21 = vld [vmem:[#allocation5 + $0x48c] ss:$16 sps:$4 sm:$0xff]   ;;  %v2727_v24 = vld [vmem:[#allocation5 + $0x488] ss:$16 sps:$4 sm:$0xff]  }
  0x88   :  { %v3050_v33 = vpack.c.bf16 %v247_v30, %v176_v29  ;;  %v2738_v26 = vld [vmem:[#allocation5 + $0x22c] ss:$16 sps:$4 sm:$0xff]  }
  0x89   :  { %1567 = vmatpush1.bf16.msra.mxu0 %v2624_v1  ;;  %v2699_v1 = vld [vmem:[#allocation5 + $0x12c] ss:$16 sps:$4 sm:$0xff]  }
  0x8a   :  { %1649 = vmatpush1.bf16.msra.mxu1 %v2621_v0  ;;  %1568 = vmatprep.subr.bf16.mxu0 %v2632_v3  ;;  %v2690_v0 = vld [vmem:[#allocation5 + $0x500] ss:$16 sps:$4 sm:$0xff]   ;;  %v2697_v3 = vld [vmem:[#allocation5 + $0x128] ss:$16 sps:$4 sm:$0xff]   ;;  %v2741_v29 = vld [vmem:[#allocation5 + $0x44c] ss:$16 sps:$4 sm:$0xff]  }
  0x8b   :  { %1650 = vmatprep.subr.bf16.mxu1 %v2629_v2  ;;  %1590 = vmatprep.mubr.bf16.mxu0 %v3050_v33  ;;  %v2702_v2 = vld [vmem:[#allocation5 + $0x2ec] ss:$16 sps:$4 sm:$0xff]  }
  0x8c   :  { %v2744_v30 = vld [vmem:[#allocation5 + $0x20c] ss:$16 sps:$4 sm:$0xff]  }
  0x8d   :  { %1569 = vmatpush1.bf16.msra.mxu0 %v2630_v5  ;;  %v2700_v5 = vld [vmem:[#allocation5 + $0x2e8] ss:$16 sps:$4 sm:$0xff]  }
  0x8e   :  { %1651 = vmatpush1.bf16.msra.mxu1 %v2627_v4  ;;  %1570 = vmatprep.subr.bf16.mxu0 %v2638_v7  ;;  %v3057_v4 = vpack.c.bf16 %v246_v63, %v175_v62  ;;  %v2708_v7 = vld [vmem:[#allocation5 + $0x2cc] ss:$16 sps:$4 sm:$0xff]  }
  0x8f   :  { %1652 = vmatprep.subr.bf16.mxu1 %v2635_v6  ;;  %v2705_v6 = vld [vmem:[#allocation5 + $0x10c] ss:$16 sps:$4 sm:$0xff]  }
  0x90   :  { %v2783_v62 = vld [vmem:[#allocation5 + $0x56c] ss:$16 sps:$4 sm:$0xff]  }
  0x91   :  { %1571 = vmatpush1.bf16.msra.mxu0 %v2636_v9  ;;  %v2706_v9 = vld [vmem:[#allocation5 + $0x2c8] ss:$16 sps:$4 sm:$0xff]   ;;  %v2786_v63 = vld [vmem:[#allocation5 + $0x32c] ss:$16 sps:$4 sm:$0xff]  }
  0x92   :  { %1653 = vmatpush1.bf16.msra.mxu1 %v2633_v8  ;;  %1572 = vmatprep.subr.bf16.mxu0 %v2644_v11  ;;  %v2703_v8 = vld [vmem:[#allocation5 + $0x108] ss:$16 sps:$4 sm:$0xff]   ;;  %v2714_v11 = vld [vmem:[#allocation5 + $0x2ac] ss:$16 sps:$4 sm:$0xff]  }
  0x93   :  { %1654 = vmatprep.subr.bf16.mxu1 %v2641_v10  ;;  %v2711_v10 = vld [vmem:[#allocation5 + $0x4ec] ss:$16 sps:$4 sm:$0xff]  }
  0x95   :  { %1573 = vmatpush1.bf16.msra.mxu0 %v2642_v13  ;;  %v2712_v13 = vld [vmem:[#allocation5 + $0x2a8] ss:$16 sps:$4 sm:$0xff]  }
  0x96   :  { %1655 = vmatpush1.bf16.msra.mxu1 %v2639_v12  ;;  %1574 = vmatprep.subr.bf16.mxu0 %v2650_v15  ;;  %v2709_v12 = vld [vmem:[#allocation5 + $0x4e8] ss:$16 sps:$4 sm:$0xff]   ;;  %v2720_v15 = vld [vmem:[#allocation5 + $0x28c] ss:$16 sps:$4 sm:$0xff]  }
  0x97   :  { %1656 = vmatprep.subr.bf16.mxu1 %v2647_v14  ;;  %v2717_v14 = vld [vmem:[#allocation5 + $0x4cc] ss:$16 sps:$4 sm:$0xff]  }
  0x99   :  { %1575 = vmatpush2.bf16.msra.mxu0 %v2648_v22  ;;  %v2732_v22 = vld [vmem:[#allocation5 + $0x24c] ss:$16 sps:$4 sm:$0xff]  }
  0x9a   :  { %1657 = vmatpush1.bf16.msra.mxu1 %v2645_v20  ;;  %1576 = vmatprep.subr.bf16.mxu0 %v2656_v28  ;;  %v2721_v20 = vld [vmem:[#allocation5 + $0x4a8] ss:$16 sps:$4 sm:$0xff]  }
  0x9b   :  { %1658 = vmatprep.subr.bf16.mxu1 %v2653_v27  ;;  %v2733_v27 = vld [vmem:[#allocation5 + $0x468] ss:$16 sps:$4 sm:$0xff]  }
  0x9c   :  { %v2736_v28 = vld [vmem:[#allocation5 + $0x228] ss:$16 sps:$4 sm:$0xff]  }
  0x9d   :  { %1577 = vmatpush2.bf16.msra.mxu0 %v2654_v32  ;;  %v2742_v32 = vld [vmem:[#allocation5 + $0x208] ss:$16 sps:$4 sm:$0xff]  }
  0x9e   :  { %1659 = vmatpush1.bf16.msra.mxu1 %v2651_v31  ;;  %1578 = vmatprep.subr.bf16.mxu0 %v2662_v34  ;;  %v2739_v31 = vld [vmem:[#allocation5 + $0x448] ss:$16 sps:$4 sm:$0xff]  }
  0x9f   :  { %1660 = vmatprep.subr.bf16.mxu1 %v2659_v55  ;;  %v2750_v55 = vld [vmem:[#allocation5 + $0x3ec] ss:$16 sps:$4 sm:$0xff]   ;;  %v2745_v34 = vld [vmem:[#allocation5 + $0x428] ss:$16 sps:$4 sm:$0xff]  }
  0xa1   :  { %1579 = vmatpush2.bf16.msra.mxu0 %v2660_v36  ;;  %v2753_v36 = vld [vmem:[#allocation5 + $0x40c] ss:$16 sps:$4 sm:$0xff]  }
  0xa2   :  { %1661 = vmatpush2.bf16.msra.mxu1 %v2657_v35  ;;  %1580 = vmatprep.subr.bf16.mxu0 %v2668_v40  ;;  %v2748_v35 = vld [vmem:[#allocation5 + $0x3e8] ss:$16 sps:$4 sm:$0xff]  }
  0xa3   :  { %1662 = vmatprep.subr.bf16.mxu1 %v2665_v37  ;;  %v2756_v37 = vld [vmem:[#allocation5 + $0x3cc] ss:$16 sps:$4 sm:$0xff]   ;;  %v2751_v40 = vld [vmem:[#allocation5 + $0x408] ss:$16 sps:$4 sm:$0xff]  }
  0xa5   :  { %1581 = vmatpush2.bf16.msra.mxu0 %v2666_v42  ;;  %v2759_v42 = vld [vmem:[#allocation5 + $0x5ec] ss:$16 sps:$4 sm:$0xff]  }
  0xa6   :  { %1663 = vmatpush2.bf16.msra.mxu1 %v2663_v41  ;;  %1582 = vmatprep.subr.bf16.mxu0 %v2674_v44  ;;  %v2754_v41 = vld [vmem:[#allocation5 + $0x3c8] ss:$16 sps:$4 sm:$0xff]  }
  0xa7   :  { %1664 = vmatprep.subr.bf16.mxu1 %v2671_v43  ;;  %v2762_v43 = vld [vmem:[#allocation5 + $0x3ac] ss:$16 sps:$4 sm:$0xff]   ;;  %v2757_v44 = vld [vmem:[#allocation5 + $0x5e8] ss:$16 sps:$4 sm:$0xff]  }
  0xa9   :  { %1583 = vmatpush2.bf16.msra.mxu0 %v2672_v46  ;;  %v2765_v46 = vld [vmem:[#allocation5 + $0x5cc] ss:$16 sps:$4 sm:$0xff]  }
  0xaa   :  { %1665 = vmatpush2.bf16.msra.mxu1 %v2669_v45  ;;  %1584 = vmatprep.subr.bf16.mxu0 %v2680_v49  ;;  %v2760_v45 = vld [vmem:[#allocation5 + $0x3a8] ss:$16 sps:$4 sm:$0xff]  }
  0xab   :  { %1666 = vmatprep.subr.bf16.mxu1 %v2677_v47  ;;  %v2768_v47 = vld [vmem:[#allocation5 + $0x38c] ss:$16 sps:$4 sm:$0xff]   ;;  %v2763_v49 = vld [vmem:[#allocation5 + $0x5c8] ss:$16 sps:$4 sm:$0xff]  }
  0xad   :  { %1585 = vmatpush2.bf16.msra.mxu0 %v2678_v51  ;;  %v2771_v51 = vld [vmem:[#allocation5 + $0x5ac] ss:$16 sps:$4 sm:$0xff]  }
  0xae   :  { %1667 = vmatpush2.bf16.msra.mxu1 %v2675_v50  ;;  %1586 = vmatprep.subr.bf16.mxu0 %v2686_v54  ;;  %v2766_v50 = vld [vmem:[#allocation5 + $0x388] ss:$16 sps:$4 sm:$0xff]  }
  0xaf   :  { %1668 = vmatprep.subr.bf16.mxu1 %v2683_v53  ;;  %v2774_v53 = vld [vmem:[#allocation5 + $0x36c] ss:$16 sps:$4 sm:$0xff]   ;;  %v2769_v54 = vld [vmem:[#allocation5 + $0x5a8] ss:$16 sps:$4 sm:$0xff]  }
  0xb1   :  { %1587 = vmatpush2.bf16.msra.mxu0 %v2684_v58  ;;  %v2777_v58 = vld [vmem:[#allocation5 + $0x58c] ss:$16 sps:$4 sm:$0xff]  }
  0xb2   :  { %1669 = vmatpush2.bf16.msra.mxu1 %v2681_v57  ;;  %1588 = vmatprep.subr.bf16.mxu0 %v2692_v60  ;;  %v2772_v57 = vld [vmem:[#allocation5 + $0x368] ss:$16 sps:$4 sm:$0xff]  }
  0xb3   :  { %1670 = vmatprep.subr.bf16.mxu1 %v2689_v59  ;;  %v2780_v59 = vld [vmem:[#allocation5 + $0x34c] ss:$16 sps:$4 sm:$0xff]   ;;  %v2775_v60 = vld [vmem:[#allocation5 + $0x588] ss:$16 sps:$4 sm:$0xff]  }
  0xb5   :  { %1589 = vmatpush2.bf16.msra.mxu0 %v2690_v0  ;;  %v2781_v0 = vld [vmem:[#allocation5 + $0x568] ss:$16 sps:$4 sm:$0xff]  }
  0xb6   :  { %1671 = vmatpush2.bf16.msra.mxu1 %v2687_v61  ;;  %1687 = vmatprep.subr.bf16.mxu0 %v2702_v2  ;;  %v2778_v61 = vld [vmem:[#allocation5 + $0x348] ss:$16 sps:$4 sm:$0xff]   ;;  %v2789_v2 = vld [vmem:[#allocation5 + $0x54c] ss:$16 sps:$4 sm:$0xff]  }
  0xb7   :  { %1672 = vmatprep.subr.bf16.mxu1 %v2699_v1  ;;  %v2784_v1 = vld [vmem:[#allocation5 + $0x328] ss:$16 sps:$4 sm:$0xff]  }
  0xb8   :  { %1591 = vmatmul.mubr.bf16.vlgmr.msra.gmra.mxu0 %v3057_v4 }
  0xb9   :  { %1688 = vmatpush1.bf16.msra.mxu0 %v2700_v5  ;;  %1719 = vmatprep.mubr.bf16.mxu0 %v3015_v23  ;;  %v2724_v23 = vld [vmem:[#allocation5 + $0x268] ss:$16 sps:$4 sm:$0xff]  }
  0xba   :  { %1673 = vmatpush2.bf16.msra.mxu1 %v2697_v3  ;;  %1689 = vmatprep.subr.bf16.mxu0 %v2708_v7  ;;  %v2792_v3 = vld [vmem:[#allocation5 + $0x30c] ss:$16 sps:$4 sm:$0xff]   ;;  %v2787_v5 = vld [vmem:[#allocation5 + $0x548] ss:$16 sps:$4 sm:$0xff]  }
  0xbb   :  { %1674 = vmatprep.subr.bf16.mxu1 %v2705_v6  ;;  %v2790_v6 = vld [vmem:[#allocation5 + $0x308] ss:$16 sps:$4 sm:$0xff]   ;;  %v2795_v7 = vld [vmem:[#allocation5 + $0x52c] ss:$16 sps:$4 sm:$0xff]  }
  0xbd   :  { %1690 = vmatpush1.bf16.msra.mxu0 %v2706_v9  ;;  %v2793_v9 = vld [vmem:[#allocation5 + $0x528] ss:$16 sps:$4 sm:$0xff]  }
  0xbe   :  { %1675 = vmatpush2.bf16.msra.mxu1 %v2703_v8  ;;  %1691 = vmatprep.subr.bf16.mxu0 %v2714_v11  ;;  %v2798_v8 = vld [vmem:[#allocation5 + $0x60c] ss:$16 sps:$4 sm:$0xff]  }
  0xbf   :  { %1730 = vmatprep.subr.bf16.mxu1 %v2711_v10  ;;  %v2796_v10 = vld [vmem:[#allocation5 + $0x608] ss:$16 sps:$4 sm:$0xff]   ;;  %v2801_v11 = vld [vmem:[#allocation5 + $0x50c] ss:$16 sps:$4 sm:$0xff]  }
  0xc1   :  { %1677 = vmatmul.mubr.bf16.vlgmr.msra.gmra.mxu1 %v3018_v38  ;;  %1692 = vmatpush1.bf16.msra.mxu0 %v2712_v13  ;;  %v2730_v38 = vld [vmem:[#allocation5 + $0x248] ss:$16 sps:$4 sm:$0xff]  }
  0xc2   :  { %1731 = vmatpush1.bf16.msra.mxu1 %v2709_v12  ;;  %1693 = vmatprep.subr.bf16.mxu0 %v2720_v15  ;;  %v2802_v12 = vld [vmem:[#allocation8 + $0x78] sm:$0xff]   ;;  %v2799_v13 = vld [vmem:[#allocation5 + $0x508] ss:$16 sps:$4 sm:$0xff]  }
  0xc3   :  { %1732 = vmatprep.subr.bf16.mxu1 %v2717_v14  ;;  %1762 = vmatprep.mubr.bf16.mxu1 %v3050_v33  ;;  %v2747_v33 = vld [vmem:[#allocation5 + $0x42c] ss:$16 sps:$4 sm:$0xff]   ;;  %v2804_v15 = vld [vmem:[#allocation8 + $0x70] sm:$0xff]  }
  0xc4   :  { %v2803_v14 = vld [vmem:[#allocation8 + $0x38] sm:$0xff]  }
  0xc5   :  { %1694 = vmatpush1.bf16.msra.mxu0 %v2718_v17  ;;  %v2806_v17 = vld [vmem:[#allocation8 + $0x68] sm:$0xff]  }
  0xc6   :  { %1733 = vmatpush1.bf16.msra.mxu1 %v2715_v16  ;;  %1695 = vmatprep.subr.bf16.mxu0 %v2726_v19  ;;  %v2805_v16 = vld [vmem:[#allocation8 + $0x30] sm:$0xff]   ;;  %v2818_v19 = vld [vmem:[#allocation8 + $0xf8] sm:$0xff]  }
  0xc7   :  { %1734 = vmatprep.subr.bf16.mxu1 %v2723_v18  ;;  %v2808_v18 = vld [vmem:[#allocation8 + $0x60] sm:$0xff]  }
  0xc9   :  { %1696 = vmatpush1.bf16.msra.mxu0 %v2724_v23  ;;  %v2809_v23 = vld [vmem:[#allocation8 + $0x20] sm:$0xff]  }
  0xca   :  { %1735 = vmatpush1.bf16.msra.mxu1 %v2721_v20  ;;  %1697 = vmatprep.subr.bf16.mxu0 %v2732_v22  ;;  %v2819_v20 = vld [vmem:[#allocation8 + $0xb8] sm:$0xff]  }
  0xcb   :  { %1736 = vmatprep.subr.bf16.mxu1 %v2729_v21  ;;  %v2810_v21 = vld [vmem:[#allocation8 + $0x58] sm:$0xff]  }
  0xcc   :  { %v2811_v22 = vld [vmem:[#allocation8 + $0x18] sm:$0xff]  }
  0xcd   :  { %1698 = vmatpush1.bf16.msra.mxu0 %v2730_v38  ;;  %v2813_v38 = vld [vmem:[#allocation8 + $0x10] sm:$0xff]  }
  0xce   :  { %1737 = vmatpush1.bf16.msra.mxu1 %v2727_v24  ;;  %1699 = vmatprep.subr.bf16.mxu0 %v2738_v26  ;;  %v2812_v24 = vld [vmem:[#allocation8 + $0x50] sm:$0xff]   ;;  %v2815_v26 = vld [vmem:[#allocation8 + $0x8] sm:$0xff]  }
  0xcf   :  { %1738 = vmatprep.subr.bf16.mxu1 %v2735_v25  ;;  %v2814_v25 = vld [vmem:[#allocation8 + $0x48] sm:$0xff]  }
  0xd1   :  { %1700 = vmatpush1.bf16.msra.mxu0 %v2736_v28  ;;  %v2817_v28 = vld [vmem:[#allocation8] sm:$0xff]  }
  0xd2   :  { %1739 = vmatpush1.bf16.msra.mxu1 %v2733_v27  ;;  %1701 = vmatprep.subr.bf16.mxu0 %v2744_v30  ;;  %v2816_v27 = vld [vmem:[#allocation8 + $0x40] sm:$0xff]  }
  0xd3   :  { %1740 = vmatprep.subr.bf16.mxu1 %v2741_v29  ;;  %v2823_v29 = vld [vmem:[#allocation8 + $0xa8] sm:$0xff]   ;;  %v2824_v30 = vld [vmem:[#allocation8 + $0xe0] sm:$0xff]  }
  0xd5   :  { %1702 = vmatpush1.bf16.msra.mxu0 %v2742_v32  ;;  %v2826_v32 = vld [vmem:[#allocation8 + $0xd8] sm:$0xff]  }
  0xd6   :  { %1741 = vmatpush1.bf16.msra.mxu1 %v2739_v31  ;;  %1703 = vmatprep.subr.bf16.mxu0 %v2750_v55  ;;  %v2825_v31 = vld [vmem:[#allocation8 + $0xa0] sm:$0xff]   ;;  %v2828_v55 = vld [vmem:[#allocation8 + $0xd0] sm:$0xff]  }
  0xd7   :  { %1742 = vmatprep.subr.bf16.mxu1 %v2747_v33  ;;  %v2827_v33 = vld [vmem:[#allocation8 + $0x98] sm:$0xff]  }
  0xd9   :  { %1704 = vmatpush2.bf16.msra.mxu0 %v2748_v35  ;;  %v2830_v35 = vld [vmem:[#allocation8 + $0xc8] sm:$0xff]  }
  0xda   :  { %1743 = vmatpush1.bf16.msra.mxu1 %v2745_v34  ;;  %1705 = vmatprep.subr.bf16.mxu0 %v2756_v37  ;;  %v2829_v34 = vld [vmem:[#allocation8 + $0x90] sm:$0xff]   ;;  %v2832_v37 = vld [vmem:[#allocation8 + $0xc0] sm:$0xff]  }
  0xdb   :  { %1744 = vmatprep.subr.bf16.mxu1 %v2753_v36  ;;  %v2831_v36 = vld [vmem:[#allocation8 + $0x88] sm:$0xff]  }
  0xdd   :  { %1706 = vmatpush2.bf16.msra.mxu0 %v2754_v41 }
  0xde   :  { %1745 = vmatpush1.bf16.msra.mxu1 %v2751_v40  ;;  %1707 = vmatprep.subr.bf16.mxu0 %v2762_v43  ;;  %v2833_v40 = vld [vmem:[#allocation8 + $0x80] sm:$0xff]  }
  0xdf   :  { %1746 = vmatprep.subr.bf16.mxu1 %v2759_v42 }
  0xe1   :  { %1708 = vmatpush2.bf16.msra.mxu0 %v2760_v45  ;;  %v474_v45 = vsub.s32 1, %v2999_v48 }
  0xe2   :  { %1747 = vmatpush2.bf16.msra.mxu1 %v2757_v44  ;;  %1709 = vmatprep.subr.bf16.mxu0 %v2768_v47 }
  0xe3   :  { %1748 = vmatprep.subr.bf16.mxu1 %v2765_v46  ;;  %v470_v46 = vsub.s32 0, %v2999_v48 }
  0xe5   :  { %1710 = vmatpush2.bf16.msra.mxu0 %v2766_v50 }
  0xe6   :  { %1749 = vmatpush2.bf16.msra.mxu1 %v2763_v49  ;;  %1711 = vmatprep.subr.bf16.mxu0 %v2774_v53  ;;  %v466_v49 = vld [vmem:[#allocation7] sm:$0xf] }
  0xe7   :  { %1750 = vmatprep.subr.bf16.mxu1 %v2771_v51  ;;  %v475_v51 = vrot.slane %v466_v49, %v474_v45  ;;  %v471_v53 = vrot.slane %v466_v49, %v470_v46 }
  0xe9   :  { %1712 = vmatpush2.bf16.msra.mxu0 %v2772_v57 }
  0xea   :  { %1751 = vmatpush2.bf16.msra.mxu1 %v2769_v54  ;;  %1713 = vmatprep.subr.bf16.mxu0 %v2780_v59 }
  0xeb   :  { %1752 = vmatprep.subr.bf16.mxu1 %v2777_v58 }
  0xed   :  { %1714 = vmatpush2.bf16.msra.mxu0 %v2778_v61 }
  0xee   :  { %1753 = vmatpush2.bf16.msra.mxu1 %v2775_v60  ;;  %1715 = vmatprep.subr.bf16.mxu0 %v2786_v63 }
  0xef   :  { %1754 = vmatprep.subr.bf16.mxu1 %v2783_v62 }
  0xf1   :  { %1716 = vmatpush2.bf16.msra.mxu0 %v2784_v1 }
  0xf2   :  { %1755 = vmatpush2.bf16.msra.mxu1 %v2781_v0  ;;  %1717 = vmatprep.subr.bf16.mxu0 %v2792_v3 }
  0xf3   :  { %1756 = vmatprep.subr.bf16.mxu1 %v2789_v2 }
  0xf5   :  { %1718 = vmatpush2.bf16.msra.mxu0 %v2790_v6 }
  0xf6   :  { %1757 = vmatpush2.bf16.msra.mxu1 %v2787_v5  ;;  %1787 = vmatprep.subr.bf16.mxu0 %v2798_v8 }
  0xf7   :  { %1758 = vmatprep.subr.bf16.mxu1 %v2795_v7 }
  0xf8   :  { %1720 = vmatmul.mubr.bf16.vlgmr.msra.gmra.mxu0 %v3020_v39  ;;  %v2807_v39 = vld [vmem:[#allocation8 + $0x28] sm:$0xff]  }
  0xf9   :  { %1788 = vmatpush1.bf16.msra.mxu0 %v2796_v10  ;;  %1805 = vmatprep.mubr.bf16.mxu0 %v2953_v52  ;;  %v2820_v52 = vld [vmem:[#allocation8 + $0xf0] sm:$0xff]  }
  0xfa   :  { %1759 = vmatpush2.bf16.msra.mxu1 %v2793_v9  ;;  %2425 = vmatprep.subr.bf16.mxu0 %v2802_v12 }
  0xfb   :  { %1760 = vmatprep.subr.bf16.mxu1 %v2801_v11 }
  0xfe   :  { %1761 = vmatpush2.bf16.msra.mxu1 %v2799_v13 }
  0xff   :  { %2447 = vmatprep.subr.bf16.mxu1 %v2818_v19 }
 0x100   :  { %2391 = vmatmul.mubr.msk.bf16.vlgmr.msra.gmra.mxu0 %vm1468_vm0, %v3029_v56  ;;  %v2822_v56 = vld [vmem:[#allocation8 + $0xe8] sm:$0xff]  }
 0x101   :  { %1763 = vmatmul.mubr.bf16.vlgmr.msra.gmra.mxu1 %v3057_v4  ;;  %2426 = vmatpush3.bf16.msra.mxu0 %v2803_v14  ;;  %v2821_v4 = vld [vmem:[#allocation8 + $0xb0] sm:$0xff]  }
 0x102   :  { %2427 = vmatprep.subr.bf16.mxu0 %v2804_v15  ;;  %2448 = vmatpush3.bf16.msra.mxu1 %v2819_v20 }
 0x103   :  { %2449 = vmatprep.subr.bf16.mxu1 %v2820_v52 }
 0x105   :  { %2428 = vmatpush3.bf16.msra.mxu0 %v2805_v16 }
 0x106   :  { %2429 = vmatprep.subr.bf16.mxu0 %v2806_v17  ;;  %2450 = vmatpush3.bf16.msra.mxu1 %v2821_v4 }
 0x107   :  { %2451 = vmatprep.subr.bf16.mxu1 %v2822_v56 }
 0x109   :  { %2430 = vmatpush3.bf16.msra.mxu0 %v2807_v39 }
 0x10a   :  { %2431 = vmatprep.subr.bf16.mxu0 %v2808_v18  ;;  %2452 = vmatpush3.bf16.msra.mxu1 %v2823_v29 }
 0x10b   :  { %2453 = vmatprep.subr.bf16.mxu1 %v2824_v30 }
 0x10d   :  { %2432 = vmatpush3.bf16.msra.mxu0 %v2809_v23 }
 0x10e   :  { %2433 = vmatprep.subr.bf16.mxu0 %v2810_v21  ;;  %2454 = vmatpush3.bf16.msra.mxu1 %v2825_v31 }
 0x10f   :  { %2455 = vmatprep.subr.bf16.mxu1 %v2826_v32 }
 0x111   :  { %2434 = vmatpush3.bf16.msra.mxu0 %v2811_v22  ;;  %v482_v22 = vsub.s32 3, %v2999_v48 }
 0x112   :  { %2435 = vmatprep.subr.bf16.mxu0 %v2812_v24  ;;  %2456 = vmatpush3.bf16.msra.mxu1 %v2827_v33  ;;  %v478_v24 = vsub.s32 2, %v2999_v48 }
 0x113   :  { %2457 = vmatprep.subr.bf16.mxu1 %v2828_v55 }
 0x115   :  { %2436 = vmatpush3.bf16.msra.mxu0 %v2813_v38 }
 0x116   :  { %2437 = vmatprep.subr.bf16.mxu0 %v2814_v25  ;;  %2458 = vmatpush3.bf16.msra.mxu1 %v2829_v34 }
 0x117   :  { %2459 = vmatprep.subr.bf16.mxu1 %v2830_v35 }
 0x119   :  { %2438 = vmatpush3.bf16.msra.mxu0 %v2815_v26 }
 0x11a   :  { %2439 = vmatprep.subr.bf16.mxu0 %v2816_v27  ;;  %2460 = vmatpush3.bf16.msra.mxu1 %v2831_v36  ;;  %v483_v27 = vrot.slane %v466_v49, %v482_v22 }
 0x11b   :  { %2461 = vmatprep.subr.bf16.mxu1 %v2832_v37 }
 0x11d   :  { %2440 = vmatpush3.bf16.msra.mxu0 %v2817_v28  ;;  %v479_v28 = vrot.slane %v466_v49, %v478_v24 }
 0x11e   :  { %2462 = vmatpush3.bf16.msra.mxu1 %v2833_v40 }
 0x138   :  { %v1506_v43 = vpop.f32.mrf.mxu0 }
 0x139   :  { %v1549_v41 = vpop.f32.mrf.mxu1  ;;  %v1507_v59 = vadd.f32 %v1506_v43, %v471_v53 }
 0x13a   :  { %v1508_v47 = vpop.f32.mrf.mxu0 }
 0x13b   :  { %v1551_v42 = vpop.f32.mrf.mxu1  ;;  %v1509_v58 = vadd.f32 %v1508_v47, %v475_v51  ;;  %v1550_v2 = vadd.f32 %v1549_v41, %v1507_v59 }
 0x13c   :  { %v1510_v54 = vpop.f32.mrf.mxu0 }
 0x13d   :  { %v1553_v44 = vpop.f32.mrf.mxu1  ;;  %v1511_v61 = vadd.f32 %v1510_v54, %v471_v53  ;;  %v1552_v0 = vadd.f32 %v1551_v42, %v1509_v58 }
 0x13e   :  { %v1512_v60 = vpop.f32.mrf.mxu0 }
 0x13f   :  { %v1555_v50 = vpop.f32.mrf.mxu1  ;;  %v1513_v1 = vadd.f32 %v1512_v60, %v475_v51  ;;  %v1554_v5 = vadd.f32 %v1553_v44, %v1511_v61 }
 0x141   :  { %v1635_v57 = vpop.f32.mrf.mxu1  ;;  %v1556_v10 = vadd.f32 %v1555_v50, %v1513_v1 }
 0x143   :  { %v1637_v62 = vpop.f32.mrf.mxu1 }
 0x145   :  { %v1639_v7 = vpop.f32.mrf.mxu1 }
 0x147   :  { %v1641_v16 = vpop.f32.mrf.mxu1 }
 0x178   :  { %v1592_v63 = vpop.f32.mrf.mxu0 }
 0x179   :  { %v1593_v8 = vadd.f32 %v1592_v63, %v1550_v2 }
 0x17a   :  { %v1594_v3 = vpop.f32.mrf.mxu0 }
 0x17b   :  { %v1595_v6 = vadd.f32 %v1594_v3, %v1552_v0  ;;  %v1636_v17 = vadd.f32 %v1635_v57, %v1593_v8 }
 0x17c   :  { %v1596_v9 = vpop.f32.mrf.mxu0 }
 0x17d   :  { %v1597_v11 = vadd.f32 %v1596_v9, %v1554_v5  ;;  %v1638_v13 = vadd.f32 %v1637_v62, %v1595_v6  ;;  %v1816_v52 = vmax.f32 %v1636_v17, 0.0 }
 0x17e   :  { %v1598_v12 = vpop.f32.mrf.mxu0 }
 0x17f   :  { %v1640_v14 = vadd.f32 %v1639_v7, %v1597_v11  ;;  %v1599_v15 = vadd.f32 %v1598_v12, %v1556_v10  ;;  %v1817_v19 = vmax.f32 %v1638_v13, 0.0  ;;  %v2392_v7 = vld [vmem:[%s3082_s4] ss:$0 sm:$0xff] }
 0x181   :  { %v1642_v39 = vadd.f32 %v1641_v16, %v1599_v15  ;;  %v1820_v18 = vmax.f32 %v1640_v14, 0.0  ;;  %v1678_v4 = vpop.f32.mrf.mxu1 }
 0x182   :  { %v1679_v33 = vadd.f32 %v1678_v4, %v479_v28 }
 0x183   :  { %v1821_v20 = vmax.f32 %v1642_v39, 0.0  ;;  %v1824_v21 = vpack.c.bf16 %v1820_v18, %v1816_v52  ;;  %v1680_v56 = vpop.f32.mrf.mxu1 }
 0x184   :  { %v1681_v32 = vadd.f32 %v1680_v56, %v483_v27 }
 0x185   :  { %v1825_v23 = vpack.c.bf16 %v1821_v20, %v1817_v19  ;;  %v1682_v25 = vpop.f32.mrf.mxu1 }
 0x186   :  { %v1683_v35 = vadd.f32 %v1682_v25, %v479_v28 }
 0x187   :  { %2123 = vmatprep.mubr.bf16.mxu0 %v1825_v23  ;;  %v1684_v30 = vpop.f32.mrf.mxu1 }
 0x188   :  { %2124 = vmatmul.mubr.bf16.vlgmr.msra.gmra.mxu0 %v1824_v21  ;;  %v1685_v42 = vadd.f32 %v1684_v30, %v483_v27 }
 0x1b8   :  { %v1721_v38 = vpop.f32.mrf.mxu0 }
 0x1b9   :  { %v1722_v37 = vadd.f32 %v1721_v38, %v1679_v33 }
 0x1ba   :  { %v1723_v26 = vpop.f32.mrf.mxu0 }
 0x1bb   :  { %v1724_v36 = vadd.f32 %v1723_v26, %v1681_v32 }
 0x1bc   :  { %v1725_v29 = vpop.f32.mrf.mxu0 }
 0x1bd   :  { %v1726_v43 = vadd.f32 %v1725_v29, %v1683_v35 }
 0x1be   :  { %v1727_v31 = vpop.f32.mrf.mxu0 }
 0x1bf   :  { %v1728_v47 = vadd.f32 %v1727_v31, %v1685_v42 }
 0x1c0   :  { %v1807_v34 = vpop.f32.mrf.mxu0 }
 0x1c1   :  { %v1764_v55 = vpop.f32.mrf.mxu1 }
 0x1c2   :  { %v1809_v41 = vpop.f32.mrf.mxu0  ;;  %v1765_v44 = vadd.f32 %v1764_v55, %v1722_v37 }
 0x1c3   :  { %v1766_v40 = vpop.f32.mrf.mxu1 }
 0x1c4   :  { %v1767_v48 = vadd.f32 %v1766_v40, %v1724_v36  ;;  %v1811_v46 = vpop.f32.mrf.mxu0  ;;  %v1808_v58 = vadd.f32 %v1807_v34, %v1765_v44 }
 0x1c5   :  { %v1768_v45 = vpop.f32.mrf.mxu1 }
 0x1c6   :  { %v1769_v49 = vadd.f32 %v1768_v45, %v1726_v43  ;;  %v1813_v51 = vpop.f32.mrf.mxu0  ;;  %v1810_v53 = vadd.f32 %v1809_v41, %v1767_v48  ;;  %v1818_v63 = vmax.f32 %v1808_v58, 0.0 }
 0x1c7   :  { %v1770_v50 = vpop.f32.mrf.mxu1 }
 0x1c8   :  { %v1812_v54 = vadd.f32 %v1811_v46, %v1769_v49  ;;  %v1771_v57 = vadd.f32 %v1770_v50, %v1728_v47  ;;  %v1819_v61 = vmax.f32 %v1810_v53, 0.0 }
 0x1ca   :  { %v1814_v59 = vadd.f32 %v1813_v51, %v1771_v57  ;;  %v1822_v60 = vmax.f32 %v1812_v54, 0.0 }
 0x1cc   :  { %v1823_v62 = vmax.f32 %v1814_v59, 0.0  ;;  %v1826_v1 = vpack.c.bf16 %v1822_v60, %v1818_v63 }
 0x1ce   :  { %v1827_v0 = vpack.c.bf16 %v1823_v62, %v1819_v61 }
 0x1d0   :  { %2164 = vmatprep.mubr.bf16.mxu1 %v1827_v0 }
 0x1d1   :  { %2165 = vmatmul.mubr.bf16.vlgmr.msra.gmra.mxu1 %v1826_v1 }
 0x248   :  { %v2441_v2 = vpop.f32.mrf.mxu0 }
 0x24a   :  { %v2442_v3 = vpop.f32.mrf.mxu0 }
 0x24b   :  { %v2443_v6 = vadd.f32 %v2442_v3, %v2441_v2 }
 0x24c   :  { %v2444_v5 = vpop.f32.mrf.mxu0 }
 0x24d   :  { %v2126_v11 = vadd.f32 %v2443_v6, %v2392_v7 }
 0x24e   :  { %v2445_v8 = vpop.f32.mrf.mxu0 }
 0x24f   :  { %v2446_v12 = vadd.f32 %v2445_v8, %v2444_v5 }
 0x251   :  { %v2129_v17 = vadd.f32 %v2446_v12, %v2392_v7 }
 0x291   :  { %v2463_v9 = vpop.f32.mrf.mxu1 }
 0x293   :  { %v2464_v10 = vpop.f32.mrf.mxu1 }
 0x294   :  { %v2465_v13 = vadd.f32 %v2464_v10, %v2463_v9 }
 0x295   :  { %v2466_v14 = vpop.f32.mrf.mxu1 }
 0x296   :  { %v2167_v15 = vadd.f32 %v2465_v13, %v2126_v11 }
 0x297   :  { %v2467_v16 = vpop.f32.mrf.mxu1 }
 0x298   :  { %2173 = vst [vmem:[#allocation10] sm:$0xff] %v2167_v15  ;;  %v2468_v39 = vadd.f32 %v2467_v16, %v2466_v14 }
 0x29a   :  { %v2170_v18 = vadd.f32 %v2468_v39, %v2129_v17 }
 0x29c   :  { %2174 = vst [vmem:[#allocation10 + $0x8] sm:$0xff] %v2170_v18 }
 0x29d   :  { %2179 = vsyncadd [#allocation4], 224  ;;  %s2954_s18 = smov [#allocation10]  }
 0x29e   :  { %s2180_s19 = sshll.u32 %s2954_s18, 4  ;;  %s2181_s19 = int_to_ptr.vmem [resolvable:$true] %s2180_s19 }
 0x29f   :  { %s2914_s20 = scalar_lea.vmem %s2181_s19, 32  ;;  %s2918_s4 = scalar_lea.vmem %s2181_s19, 256 }
 0x2a0   :  { %p2915_p6 = scmp.ne.s32.totalorder %s2181_s19, %s2914_s20  ;;  %p2919_p7 = scmp.lt.s32.totalorder %s2181_s19, %s2181_s19 }
 0x2a1   :  { %p2920_p8 = scmp.lt.s32.totalorder %s2918_s4, %s2914_s20 }
 0x2a3   :  { %p2921_p9 = por %p2920_p8, %p2919_p7 }
 0x2a5   :  { %p2922_p10 = pnand %p2921_p9, %p2915_p6 }
 0x2a7   :  { %2925 = shalt.err (!%p2922_p10)
}
 0x2a8   :  { %s2955_s21 = smov 32   ;;  %s2956_s22 = smov 2  }
 0x2a9   :  { %2186 = dma.vmem_to_hbm [thread:$0]  %s2181_s19, 32, %s3083_s5, [#allocation4], %s2955_s21, %s2955_s21, %s2956_s22  }
 0x2aa   :  { %2940 = dma.done.wait [#allocation4], 256  }
 0x2ab   :  { %2941 = vsyncadd [#allocation4], 4294967040 }
 0x2ac   :  { %2190 = vsyncpa [#allocation3], 1 }
 0x2ad   :  { %2191 = vsyncpa [#allocation6], 1 }
 0x2ae   :  { %2192 = vsyncpa [#allocation9], 1 }
 0x2af   :  { %2193 = vsyncpa [#allocation4], 1 }

</bundles_post_ra>
